<compile_context>
chip_gen: v6e
topology: v6e:2x2x1
jax: 0.10.0
libtpu: 0.0.40
codegen_flags: <defaults>
</compile_context>

<pallas_src>
import functools

import jax
import jax.numpy as jnp
from jax.experimental import pallas as pl
from jax.experimental.pallas import tpu as pltpu

LANE = 128
SUBLANE = 8
DEFAULT_TILE_B = 512  # rows; sized for 64 MiB VMEM (v7x) with large headroom


def _round_up(n, m):
    return ((n + m - 1) // m) * m


def mlp_kernel(x_ref, w1_ref, w2_ref, w3_ref, b_ref, o_ref, *, h1p, h2p, outp):
    # x tile is DMA'd in its native dtype; cast to bf16 here (no wrapper-side
    # HBM round trip), accumulate every dot in f32 on the MXU.
    x = x_ref[...].astype(jnp.bfloat16)
    b = b_ref[...]  # (3, max padded width), f32

    h1 = jnp.dot(x, w1_ref[...], preferred_element_type=jnp.float32)
    h1 = jnp.maximum(h1 + b[0:1, :h1p], 0.0)

    h2 = jnp.dot(h1.astype(jnp.bfloat16), w2_ref[...],
                 preferred_element_type=jnp.float32)
    h2 = jnp.maximum(h2 + b[1:2, :h2p], 0.0)

    out = jnp.dot(h2.astype(jnp.bfloat16), w3_ref[...],
                  preferred_element_type=jnp.float32)
    o_ref[...] = (out + b[2:3, :outp]).astype(o_ref.dtype)


def pack_params(params):
    """Pad/pack master f32 params for the kernel.

    params = (w1, b1, w2, b2, w3, b3), w_i of shape (in, out), b_i of (1, out).
    Weights -> bf16, lane-padded to multiples of 128 on their output dim (and
    matching input dim for layers 2/3). Biases -> one f32 (3, P) slab.
    Zero padding is exact: ReLU(0) = 0 and zero rows/columns contribute nothing.
    """
    w1, b1, w2, b2, w3, b3 = params
    n_in, h1 = w1.shape
    _, h2 = w2.shape
    _, n_out = w3.shape
    h1p = _round_up(h1, LANE)
    h2p = _round_up(h2, LANE)
    outp = _round_up(n_out, LANE)

    def pad_w(w, rows, cols):
        out = jnp.zeros((rows, cols), jnp.bfloat16)
        return out.at[: w.shape[0], : w.shape[1]].set(w.astype(jnp.bfloat16))

    w1p = pad_w(w1, n_in, h1p)
    w2p = pad_w(w2, h1p, h2p)
    w3p = pad_w(w3, h2p, outp)

    bp = max(h1p, h2p, outp)
    b_pack = jnp.zeros((3, bp), jnp.float32)
    b_pack = b_pack.at[0, :h1].set(b1[0].astype(jnp.float32))
    b_pack = b_pack.at[1, :h2].set(b2[0].astype(jnp.float32))
    b_pack = b_pack.at[2, :n_out].set(b3[0].astype(jnp.float32))

    return {
        "w1": w1p, "w2": w2p, "w3": w3p, "b": b_pack,
        "n_in": n_in, "h1p": h1p, "h2p": h2p, "outp": outp, "n_out": n_out,
    }


def simple_mlp_forward(x, packed, tile_b=DEFAULT_TILE_B):
    """Forward pass of Simple_MLP_Base on padded/packed params."""
    n_in = packed["n_in"]
    h1p, h2p, outp = packed["h1p"], packed["h2p"], packed["outp"]
    n_out = packed["n_out"]

    B = x.shape[0]
    # Tile rows: multiple of 8 (sublane), capped at tile_b; pad B up to a
    # multiple of the tile so the batch grid is exact.
    tb = min(_round_up(tile_b, SUBLANE), _round_up(B, SUBLANE))
    Bp = _round_up(B, tb)
    if Bp != B:
        x = jnp.pad(x, ((0, Bp - B), (0, 0)))

    kernel = functools.partial(mlp_kernel, h1p=h1p, h2p=h2p, outp=outp)

    out = pl.pallas_call(
        kernel,
        out_shape=jax.ShapeDtypeStruct((Bp, outp), jnp.float32),
        grid=(Bp // tb,),
        in_specs=[
            pl.BlockSpec((tb, n_in), lambda i: (i, 0)),      # x: batch-tiled
            pl.BlockSpec((n_in, h1p), lambda i: (0, 0)),     # W1: resident
            pl.BlockSpec((h1p, h2p), lambda i: (0, 0)),      # W2: resident
            pl.BlockSpec((h2p, outp), lambda i: (0, 0)),     # W3: resident
            pl.BlockSpec(packed["b"].shape, lambda i: (0, 0)),  # biases slab
        ],
        out_specs=pl.BlockSpec((tb, outp), lambda i: (i, 0)),
        compiler_params=pltpu.CompilerParams(
            dimension_semantics=("parallel",),        # megacore split on v7x
            vmem_limit_bytes=32 * 1024 * 1024,        # fits v7x 64 MiB budget
        ),
    )(x, packed["w1"], packed["w2"], packed["w3"], packed["b"])

    return out[:B, :n_out]


# ---------------- init (matches the torch module's init scheme) -------------

def kaiming_normal(key, fan_in, fan_out):
    # torch.nn.init.kaiming_normal_ default: fan_in mode, gain sqrt(2).
    std = jnp.sqrt(2.0 / fan_in)
    # torch weight shape is (out, in); store transposed as (in, out).
    return (jax.random.normal(key, (fan_out, fan_in), dtype=jnp.float32) * std).T


def linear_bias_uniform(key, fan_in, fan_out):
    # nn.Linear default bias init: U(-1/sqrt(fan_in), 1/sqrt(fan_in))
    bound = 1.0 / jnp.sqrt(fan_in)
    return jax.random.uniform(
        key, (1, fan_out), dtype=jnp.float32, minval=-bound, maxval=bound
    )


def init_params(key, num_inputs, hidden1, hidden2, num_outputs):
    k = jax.random.split(key, 6)
    w1 = kaiming_normal(k[0], num_inputs, hidden1)
    b1 = linear_bias_uniform(k[1], num_inputs, hidden1)
    w2 = kaiming_normal(k[2], hidden1, hidden2)
    b2 = linear_bias_uniform(k[3], hidden1, hidden2)
    w3 = kaiming_normal(k[4], hidden2, num_outputs)
    b3 = linear_bias_uniform(k[5], hidden2, num_outputs)
    return (w1, b1, w2, b2, w3, b3)


if __name__ == "__main__":
    # Small shapes consistent with the module (params.HIDDEN_1_SIZE=64,
    # params.HIDDEN_2_SIZE=32).
    batch = 8
    num_inputs = 32
    hidden1 = 64
    hidden2 = 32
    num_outputs = 8

    key = jax.random.PRNGKey(0)
    pkey, xkey = jax.random.split(key)
    params = init_params(pkey, num_inputs, hidden1, hidden2, num_outputs)
    x = jax.random.normal(xkey, (batch, num_inputs), dtype=jnp.float32)

    packed = pack_params(params)
    out = simple_mlp_forward(x, packed)
    jax.block_until_ready(out)
    assert out.shape == (batch, num_outputs)

    w1, b1, w2, b2, w3, b3 = params

    # Reference 1: same bf16-input / f32-accumulate arithmetic as the kernel
    # (tight check of the kernel machinery).
    def bdot(a, w):
        return jnp.dot(a.astype(jnp.bfloat16), w.astype(jnp.bfloat16),
                       preferred_element_type=jnp.float32)

    ref_bf16 = jnp.maximum(bdot(x, w1) + b1, 0.0)
    ref_bf16 = jnp.maximum(bdot(ref_bf16, w2) + b2, 0.0)
    ref_bf16 = bdot(ref_bf16, w3) + b3
    assert jnp.allclose(out, ref_bf16, atol=1e-3, rtol=1e-3)

    # Reference 2: full-f32 torch-semantics forward (loose tolerance covers
    # the bf16 weight/activation rounding).
    ref_f32 = jnp.maximum(x @ w1 + b1, 0.0)
    ref_f32 = jnp.maximum(ref_f32 @ w2 + b2, 0.0)
    ref_f32 = ref_f32 @ w3 + b3
    assert jnp.allclose(out, ref_f32, atol=5e-2, rtol=5e-2)

    print("KERNEL_OK")
</pallas_src>

<mosaic_0001>
module attributes {stable_mosaic.version = 11 : i64} {
  func.func @mlp_kernel(%arg0: i32, %arg1: memref<8x32xf32, #tpu.memory_space<vmem>>, %arg2: memref<32x128xbf16, #tpu.memory_space<vmem>>, %arg3: memref<128x128xbf16, #tpu.memory_space<vmem>>, %arg4: memref<128x128xbf16, #tpu.memory_space<vmem>>, %arg5: memref<3x128xf32, #tpu.memory_space<vmem>>, %arg6: memref<8x128xf32, #tpu.memory_space<vmem>>) attributes {dimension_semantics = [#tpu.dimension_semantics<parallel>], iteration_bounds = array<i64: 1>, scalar_prefetch = 0 : i64, scratch_operands = 0 : i64, tpu.core_type = #tpu.core_type<tc>, window_params = [{transform_indices = @transform_0, window_bounds = array<i64: 8, 32>}, {pipeline_mode = #tpu.pipeline_mode<synchronous>, transform_indices = @transform_1, window_bounds = array<i64: 32, 128>}, {pipeline_mode = #tpu.pipeline_mode<synchronous>, transform_indices = @transform_2, window_bounds = array<i64: 128, 128>}, {pipeline_mode = #tpu.pipeline_mode<synchronous>, transform_indices = @transform_3, window_bounds = array<i64: 128, 128>}, {pipeline_mode = #tpu.pipeline_mode<synchronous>, transform_indices = @transform_4, window_bounds = array<i64: 3, 128>}, {transform_indices = @transform_5, window_bounds = array<i64: 8, 128>}]} {
    %c0 = arith.constant 0 : index
    %c0_0 = arith.constant 0 : index
    %0 = vector.load %arg1[%c0, %c0_0] : memref<8x32xf32, #tpu.memory_space<vmem>>, vector<8x32xf32>
    %1 = arith.truncf %0 : vector<8x32xf32> to vector<8x32xbf16>
    %c0_1 = arith.constant 0 : index
    %c0_2 = arith.constant 0 : index
    %2 = vector.load %arg5[%c0_1, %c0_2] : memref<3x128xf32, #tpu.memory_space<vmem>>, vector<3x128xf32>
    %c0_3 = arith.constant 0 : index
    %c0_4 = arith.constant 0 : index
    %3 = vector.load %arg2[%c0_3, %c0_4] : memref<32x128xbf16, #tpu.memory_space<vmem>>, vector<32x128xbf16>
    %cst = arith.constant dense<0.000000e+00> : vector<8x128xf32>
    %4 = tpu.matmul %1, %3, %cst {dimension_numbers = #tpu.dot_dimension_numbers<[1], [0], [0], [1], [0, 0, 1, 1], [], []>} : vector<8x32xbf16>, vector<32x128xbf16>, vector<8x128xf32> -> vector<8x128xf32>
    %5 = vector.extract_strided_slice %2 {offsets = [0, 0], sizes = [1, 128], strides = [1, 1]} : vector<3x128xf32> to vector<1x128xf32>
    %6 = vector.broadcast %5 : vector<1x128xf32> to vector<8x128xf32>
    %7 = arith.addf %4, %6 : vector<8x128xf32>
    %cst_5 = arith.constant 0.000000e+00 : f32
    %8 = vector.broadcast %cst_5 : f32 to vector<8x128xf32>
    %9 = arith.maximumf %7, %8 : vector<8x128xf32>
    %10 = arith.truncf %9 : vector<8x128xf32> to vector<8x128xbf16>
    %c0_6 = arith.constant 0 : index
    %c0_7 = arith.constant 0 : index
    %11 = vector.load %arg3[%c0_6, %c0_7] : memref<128x128xbf16, #tpu.memory_space<vmem>>, vector<128x128xbf16>
    %cst_8 = arith.constant dense<0.000000e+00> : vector<8x128xf32>
    %12 = tpu.matmul %10, %11, %cst_8 {dimension_numbers = #tpu.dot_dimension_numbers<[1], [0], [0], [1], [0, 0, 1, 1], [], []>} : vector<8x128xbf16>, vector<128x128xbf16>, vector<8x128xf32> -> vector<8x128xf32>
    %13 = vector.extract_strided_slice %2 {offsets = [1, 0], sizes = [1, 128], strides = [1, 1]} : vector<3x128xf32> to vector<1x128xf32>
    %14 = vector.broadcast %13 : vector<1x128xf32> to vector<8x128xf32>
    %15 = arith.addf %12, %14 : vector<8x128xf32>
    %cst_9 = arith.constant 0.000000e+00 : f32
    %16 = vector.broadcast %cst_9 : f32 to vector<8x128xf32>
    %17 = arith.maximumf %15, %16 : vector<8x128xf32>
    %18 = arith.truncf %17 : vector<8x128xf32> to vector<8x128xbf16>
    %c0_10 = arith.constant 0 : index
    %c0_11 = arith.constant 0 : index
    %19 = vector.load %arg4[%c0_10, %c0_11] : memref<128x128xbf16, #tpu.memory_space<vmem>>, vector<128x128xbf16>
    %cst_12 = arith.constant dense<0.000000e+00> : vector<8x128xf32>
    %20 = tpu.matmul %18, %19, %cst_12 {dimension_numbers = #tpu.dot_dimension_numbers<[1], [0], [0], [1], [0, 0, 1, 1], [], []>} : vector<8x128xbf16>, vector<128x128xbf16>, vector<8x128xf32> -> vector<8x128xf32>
    %21 = vector.extract_strided_slice %2 {offsets = [2, 0], sizes = [1, 128], strides = [1, 1]} : vector<3x128xf32> to vector<1x128xf32>
    %22 = vector.broadcast %21 : vector<1x128xf32> to vector<8x128xf32>
    %23 = arith.addf %20, %22 : vector<8x128xf32>
    %c0_13 = arith.constant 0 : index
    %c0_14 = arith.constant 0 : index
    %24 = vector.load %arg6[%c0_13, %c0_14] : memref<8x128xf32, #tpu.memory_space<vmem>>, vector<8x128xf32>
    tpu.vector_store %arg6[%c0_13, %c0_14], %23 {strides = array<i32>} : memref<8x128xf32, #tpu.memory_space<vmem>>, vector<8x128xf32>,
    return
  }
  func.func @transform_0(%arg0: i32) -> (i32, i32) {
    %c0_i32 = arith.constant 0 : i32
    %c0_i32_0 = arith.constant 0 : i32
    return %arg0, %c0_i32 : i32, i32
  }
  func.func @transform_1(%arg0: i32) -> (i32, i32) {
    %c0_i32 = arith.constant 0 : i32
    %c0_i32_0 = arith.constant 0 : i32
    %c0_i32_1 = arith.constant 0 : i32
    return %c0_i32, %c0_i32_0 : i32, i32
  }
  func.func @transform_2(%arg0: i32) -> (i32, i32) {
    %c0_i32 = arith.constant 0 : i32
    %c0_i32_0 = arith.constant 0 : i32
    %c0_i32_1 = arith.constant 0 : i32
    return %c0_i32, %c0_i32_0 : i32, i32
  }
  func.func @transform_3(%arg0: i32) -> (i32, i32) {
    %c0_i32 = arith.constant 0 : i32
    %c0_i32_0 = arith.constant 0 : i32
    %c0_i32_1 = arith.constant 0 : i32
    return %c0_i32, %c0_i32_0 : i32, i32
  }
  func.func @transform_4(%arg0: i32) -> (i32, i32) {
    %c0_i32 = arith.constant 0 : i32
    %c0_i32_0 = arith.constant 0 : i32
    %c0_i32_1 = arith.constant 0 : i32
    return %c0_i32, %c0_i32_0 : i32, i32
  }
  func.func @transform_5(%arg0: i32) -> (i32, i32) {
    %c0_i32 = arith.constant 0 : i32
    %c0_i32_0 = arith.constant 0 : i32
    return %arg0, %c0_i32 : i32, i32
  }
}

</mosaic_0001>

<bundles_post_ra>
// kernel: tpu_custom_call.1
= control target key start
LH: loop header
LB: loop body
LE: loop exit
PB: predicated region body
PF: predicated region fallthrough
CT: control target
= control target key end

     0   :  { %10 = vsyncpa [#allocation3], 0  ;;  %s693_s0 = inlined_call_operand.hbm [shape: f32[8,32], index: 0, kind: input, shape index: {}]   ;;  %s694_s1 = inlined_call_operand.hbm [shape: bf16[32,128], index: 1, kind: input, shape index: {}]   ;;  %s695_s2 = inlined_call_operand.hbm [shape: bf16[128,128], index: 2, kind: input, shape index: {}]   ;;  %s696_s3 = inlined_call_operand.hbm [shape: bf16[128,128], index: 3, kind: input, shape index: {}]   ;;  %s697_s4 = inlined_call_operand.vmem [shape: f32[3,128], index: 4, kind: input, shape index: {}]   ;;  %s698_s5 = inlined_call_operand.hbm [shape: f32[8,128], index: 5, kind: output, shape index: {}]  }
   0x1   :  { %11 = vsyncpa [#allocation6], 0 }
   0x2   :  { %12 = vsyncpa [#allocation9], 0 }
   0x3   :  { %13 = vsyncpa [#allocation4], 0  ;;  %s603_s18 = smov [#allocation5]  }
   0x4   :  { %s29_s19 = sshll.u32 %s603_s18, 4  ;;  %s30_s19 = int_to_ptr.vmem [resolvable:$true] %s29_s19 }
   0x5   :  { %s503_s20 = scalar_lea.vmem %s30_s19, 256  ;;  %p508_p1 = scmp.lt.s32.totalorder %s30_s19, %s30_s19 }
   0x6   :  { %p504_p0 = scmp.ne.s32.totalorder %s30_s19, %s503_s20  ;;  %p509_p2 = scmp.lt.s32.totalorder %s503_s20, %s503_s20 }
   0x8   :  { %p510_p3 = por %p509_p2, %p508_p1 }
   0xa   :  { %p511_p4 = pnand %p510_p3, %p504_p0 }
   0xc   :  { %514 = shalt.err (!%p511_p4)
}
   0xd   :  { %s604_s21 = smov 64   ;;  %s605_s22 = smov 4  }
   0xe   :  { %35 = dma.hbm_to_vmem [thread:$0]  %s694_s1, 256, %s30_s19, [#allocation6], %s604_s21, %s604_s21, %s605_s22  }
   0xf   :  { %s606_s25 = smov [#allocation2]   ;;  %s607_s27 = smov [#allocation7]  }
  0x10   :  { %s20_s26 = sshll.u32 %s606_s25, 4  ;;  %s41_s28 = sshll.u32 %s607_s27, 4  ;;  %s21_s26 = int_to_ptr.vmem [resolvable:$true] %s20_s26  ;;  %s42_s28 = int_to_ptr.vmem [resolvable:$true] %s41_s28 }
  0x11   :  { %s523_s29 = scalar_lea.vmem %s21_s26, 128  ;;  %p528_p6 = scmp.lt.s32.totalorder %s21_s26, %s21_s26 }
  0x12   :  { %p524_p5 = scmp.ne.s32.totalorder %s21_s26, %s523_s29  ;;  %p529_p7 = scmp.lt.s32.totalorder %s523_s29, %s523_s29 }
  0x14   :  { %p530_p8 = por %p529_p7, %p528_p6 }
  0x16   :  { %p531_p9 = pnand %p530_p8, %p524_p5 }
  0x18   :  { %534 = shalt.err (!%p531_p9)
}
  0x19   :  { %23 = dma.hbm_to_vmem [thread:$0]  %s693_s0, 128, %s21_s26, [#allocation3]  }
  0x1a   :  { %s543_s7 = scalar_lea.vmem %s42_s28, 1024  ;;  %p548_p11 = scmp.lt.s32.totalorder %s42_s28, %s42_s28 }
  0x1b   :  { %p544_p10 = scmp.ne.s32.totalorder %s42_s28, %s543_s7  ;;  %p549_p12 = scmp.lt.s32.totalorder %s543_s7, %s543_s7 }
  0x1d   :  { %p550_p13 = por %p549_p12, %p548_p11 }
  0x1f   :  { %p551_p0 = pnand %p550_p13, %p544_p10 }
  0x21   :  { %554 = shalt.err (!%p551_p0)
}
  0x22   :  { %47 = dma.hbm_to_vmem [thread:$0]  %s695_s2, 1024, %s42_s28, [#allocation6], %s604_s21, %s604_s21, %s605_s22  }
  0x23   :  { %s608_s9 = smov [#allocation8]  }
  0x24   :  { %s53_s10 = sshll.u32 %s608_s9, 4  ;;  %s54_s10 = int_to_ptr.vmem [resolvable:$true] %s53_s10 }
  0x25   :  { %s563_s11 = scalar_lea.vmem %s54_s10, 1024  ;;  %p568_p2 = scmp.lt.s32.totalorder %s54_s10, %s54_s10 }
  0x26   :  { %p564_p1 = scmp.ne.s32.totalorder %s54_s10, %s563_s11  ;;  %p569_p3 = scmp.lt.s32.totalorder %s563_s11, %s563_s11 }
  0x28   :  { %p570_p4 = por %p569_p3, %p568_p2 }
  0x2a   :  { %p571_p5 = pnand %p570_p4, %p564_p1 }
  0x2c   :  { %574 = shalt.err (!%p571_p5)
}
  0x2d   :  { %59 = dma.hbm_to_vmem [thread:$0]  %s696_s3, 1024, %s54_s10, [#allocation9], %s604_s21, %s604_s21, %s605_s22  }
  0x2e   :  { %595 = dma.done.wait [#allocation3], 128  }
  0x2f   :  { %596 = vsyncadd [#allocation3], 4294967168 }
  0x30   :  { %597 = dma.done.wait [#allocation6], 1280  }
  0x31   :  { %598 = vsyncadd [#allocation6], 4294966016 }
  0x32   :  { %599 = dma.done.wait [#allocation9], 1024  }
  0x33   :  { %600 = vsyncadd [#allocation9], 4294966272  ;;  %v609_v0 = vmov 0.0   ;;  %vm610_vm0 = vmmov 0   ;;  %v477_v1 = vld [vmem:[#allocation5 + $0x8] sm:$0xff]   ;;  %v478_v2 = vld [vmem:[#allocation5] sm:$0xff]   ;;  %v82_v19 = vlaneseq }
  0x34   :  { %420 = vmatprep.subr.bf16.mxu0 %v609_v0  ;;  %424 = vmatprep.mubr.msk.bf16.mxu0 %vm610_vm0, %v609_v0  ;;  %v75_v3 = vld [vmem:[#allocation2] sm:$0xff]  ;;  %v479_v4 = vld [vmem:[#allocation7 + $0x38] sm:$0xff]   ;;  %v480_v6 = vld [vmem:[#allocation7 + $0x30] sm:$0xff]   ;;  %vm98_vm1 = vcmask 261120  }
  0x35   :  { %428 = vmatprep.subr.bf16.mxu1 %v609_v0  ;;  %444 = vmatprep.mubr.msk.bf16.mxu1 %vm610_vm0, %v609_v0  ;;  %v76_v5 = vpack.c.bf16 %v75_v3, %v75_v3  ;;  %v481_v7 = vld [vmem:[#allocation7 + $0x28] sm:$0xff]   ;;  %v482_v8 = vld [vmem:[#allocation7 + $0x20] sm:$0xff]   ;;  %v483_v9 = vld [vmem:[#allocation7 + $0x18] sm:$0xff]   ;;  %v83_v20 = vshrl.u32 %v82_v19, 7 }
  0x36   :  { %421 = vmatpush3.bf16.msra.mxu0 %v477_v1  ;;  %429 = vmatpush3.bf16.msra.mxu1 %v479_v4  ;;  %v484_v10 = vld [vmem:[#allocation7 + $0x10] sm:$0xff]   ;;  %v485_v11 = vld [vmem:[#allocation7 + $0x8] sm:$0xff]   ;;  %v486_v12 = vld [vmem:[#allocation7] sm:$0xff]  }
  0x37   :  { %422 = vmatprep.subr.bf16.mxu0 %v609_v0  ;;  %430 = vmatprep.subr.bf16.mxu1 %v609_v0  ;;  %v487_v13 = vld [vmem:[#allocation8 + $0x38] sm:$0xff]   ;;  %v488_v14 = vld [vmem:[#allocation8 + $0x30] sm:$0xff]   ;;  %v489_v15 = vld [vmem:[#allocation8 + $0x28] sm:$0xff]   ;;  %v84_v21 = vsub.s32 0, %v83_v20  ;;  %v162_v33 = vsub.s32 1, %v83_v20  ;;  %v272_v42 = vsub.s32 2, %v83_v20 }
  0x38   :  { %v490_v16 = vld [vmem:[#allocation8 + $0x20] sm:$0xff]   ;;  %v491_v17 = vld [vmem:[#allocation8 + $0x18] sm:$0xff]   ;;  %v492_v18 = vld [vmem:[#allocation8 + $0x10] sm:$0xff]  }
  0x39   :  { %v77_v22 = vld [vmem:[%s697_s4] sm:$0x7]  ;;  %v494_v32 = vld [vmem:[#allocation8] sm:$0xff]   ;;  %s611_s4 = smov [#allocation10]  }
  0x3a   :  { %423 = vmatpush3.bf16.msra.mxu0 %v478_v2  ;;  %431 = vmatpush3.bf16.msra.mxu1 %v480_v6  ;;  %v85_v23 = vrot.slane %v77_v22, %v84_v21  ;;  %v493_v31 = vld [vmem:[#allocation8 + $0x8] sm:$0xff]   ;;  %v163_v34 = vrot.slane %v77_v22, %v162_v33  ;;  %v273_v43 = vrot.slane %v77_v22, %v272_v42  ;;  %s369_s13 = sshll.u32 %s611_s4, 4  ;;  %s370_s13 = int_to_ptr.vmem [resolvable:$true] %s369_s13 }
  0x3b   :  { %448 = vmatprep.subr.bf16.mxu0 %v609_v0  ;;  %432 = vmatprep.subr.bf16.mxu1 %v609_v0  ;;  %s575_s14 = scalar_lea.vmem %s370_s13, 128  ;;  %p580_p7 = scmp.lt.s32.totalorder %s370_s13, %s370_s13 }
  0x3c   :  { %p576_p6 = scmp.ne.s32.totalorder %s370_s13, %s575_s14  ;;  %p581_p8 = scmp.lt.s32.totalorder %s575_s14, %s575_s14 }
  0x3d   :  { %425 = vmatmul.mubr.msk.bf16.vlgmr.msra.gmra.mxu0 %vm98_vm1, %v76_v5 }
  0x3e   :  { %464 = vmatprep.mubr.msk.bf16.mxu0 %vm610_vm0, %v609_v0  ;;  %433 = vmatpush3.bf16.msra.mxu1 %v481_v7  ;;  %p582_p9 = por %p581_p8, %p580_p7 }
  0x3f   :  { %434 = vmatprep.subr.bf16.mxu1 %v609_v0  ;;  %449 = vmatpush3.bf16.msra.mxu0 %v487_v13 }
  0x40   :  { %450 = vmatprep.subr.bf16.mxu0 %v609_v0  ;;  %p583_p10 = pnand %p582_p9, %p576_p6 }
  0x42   :  { %435 = vmatpush3.bf16.msra.mxu1 %v482_v8 }
  0x43   :  { %436 = vmatprep.subr.bf16.mxu1 %v609_v0  ;;  %451 = vmatpush3.bf16.msra.mxu0 %v488_v14 }
  0x44   :  { %452 = vmatprep.subr.bf16.mxu0 %v609_v0 }
  0x46   :  { %437 = vmatpush3.bf16.msra.mxu1 %v483_v9 }
  0x47   :  { %438 = vmatprep.subr.bf16.mxu1 %v609_v0  ;;  %453 = vmatpush3.bf16.msra.mxu0 %v489_v15 }
  0x48   :  { %454 = vmatprep.subr.bf16.mxu0 %v609_v0 }
  0x4a   :  { %439 = vmatpush3.bf16.msra.mxu1 %v484_v10 }
  0x4b   :  { %440 = vmatprep.subr.bf16.mxu1 %v609_v0  ;;  %455 = vmatpush3.bf16.msra.mxu0 %v490_v16 }
  0x4c   :  { %456 = vmatprep.subr.bf16.mxu0 %v609_v0 }
  0x4e   :  { %441 = vmatpush3.bf16.msra.mxu1 %v485_v11 }
  0x4f   :  { %442 = vmatprep.subr.bf16.mxu1 %v609_v0  ;;  %457 = vmatpush3.bf16.msra.mxu0 %v491_v17 }
  0x50   :  { %458 = vmatprep.subr.bf16.mxu0 %v609_v0 }
  0x52   :  { %443 = vmatpush3.bf16.msra.mxu1 %v486_v12 }
  0x53   :  { %459 = vmatpush3.bf16.msra.mxu0 %v492_v18 }
  0x54   :  { %460 = vmatprep.subr.bf16.mxu0 %v609_v0 }
  0x57   :  { %461 = vmatpush3.bf16.msra.mxu0 %v493_v31 }
  0x58   :  { %462 = vmatprep.subr.bf16.mxu0 %v609_v0 }
  0x5b   :  { %463 = vmatpush3.bf16.msra.mxu0 %v494_v32 }
  0xfd   :  { %v136_v24 = vpop.f32.mrf.mxu0 }
  0xfe   :  { %v137_v25 = vadd.f32 %v136_v24, %v85_v23 }
  0xff   :  { %v426_v26 = vpop.f32.mrf.mxu0 }
 0x100   :  { %v142_v27 = vmax.f32 %v137_v25, 0.0 }
 0x101   :  { %v139_v28 = vpop.f32.mrf.mxu0 }
 0x102   :  { %v143_v29 = vpack.c.bf16 %v142_v27, %v142_v27 }
 0x103   :  { %v427_v30 = vpop.f32.mrf.mxu0 }
 0x104   :  { %445 = vmatmul.mubr.bf16.vlgmr.msra.gmra.mxu1 %v143_v29 }
 0x1c4   :  { %v246_v35 = vpop.f32.mrf.mxu1 }
 0x1c5   :  { %v247_v36 = vadd.f32 %v246_v35, %v163_v34 }
 0x1c6   :  { %v446_v37 = vpop.f32.mrf.mxu1 }
 0x1c7   :  { %v252_v38 = vmax.f32 %v247_v36, 0.0 }
 0x1c8   :  { %v249_v39 = vpop.f32.mrf.mxu1 }
 0x1c9   :  { %v253_v40 = vpack.c.bf16 %v252_v38, %v252_v38 }
 0x1ca   :  { %v447_v41 = vpop.f32.mrf.mxu1 }
 0x1cb   :  { %465 = vmatmul.mubr.bf16.vlgmr.msra.gmra.mxu0 %v253_v40 }
 0x28b   :  { %v356_v44 = vpop.f32.mrf.mxu0 }
 0x28c   :  { %v357_v45 = vadd.f32 %v356_v44, %v273_v43 }
 0x28d   :  { %v466_v46 = vpop.f32.mrf.mxu0 }
 0x28e   :  { %362 = vst [vmem:[#allocation10] sm:$0xff] %v357_v45 }
 0x28f   :  { %v359_v47 = vpop.f32.mrf.mxu0 }
 0x290   :  { %586 = shalt.err (!%p583_p10)
}
 0x291   :  { %372 = dma.vmem_to_hbm [thread:$0]  %s370_s13, 128, %s698_s5, [#allocation4]   ;;  %v467_v48 = vpop.f32.mrf.mxu0 }
 0x292   :  { %601 = dma.done.wait [#allocation4], 128  }
 0x293   :  { %602 = vsyncadd [#allocation4], 4294967168 }
 0x294   :  { %376 = vsyncpa [#allocation3], 1 }
 0x295   :  { %377 = vsyncpa [#allocation6], 1 }
 0x296   :  { %378 = vsyncpa [#allocation9], 1 }
 0x297   :  { %379 = vsyncpa [#allocation4], 1 }

</bundles_post_ra>
